<compile_context>
chip_gen: v7x
topology: tpu7x:2x2x1
jax: 0.10.0
libtpu: 0.0.40
codegen_flags: <defaults>
</compile_context>

<pallas_src>
import functools

import jax
import jax.numpy as jnp
from jax.experimental import pallas as pl
from jax.experimental.pallas import tpu as pltpu

NEG_SLOPE = 0.2      # GATConv LeakyReLU negative slope (PyG default)
NEG_INF = -1e30


def fused_gat_kernel(x_ref, w1_ref, asrc1_ref, adst1_ref, b1_ref,
                     w2_ref, asrc2_ref, adst2_ref, b2_ref, adj_ref,
                     rmat_ref, mmat_ref, smat_ref, out_ref,
                     *, heads: int, hidden: int):
    """Both GATConv layers (PyG semantics) on a whole (small) graph in VMEM."""
    H, C = heads, hidden
    N = adj_ref.shape[0]

    adj = adj_ref[...]                       # [N, N]    0/1 (self-loops included)
    R = rmat_ref[...]                        # [H, H*N]  R[h, h*N+j] = 1
    M = mmat_ref[...]                        # [N, H*N]  M[k, h*N+j] = (k == j)
    S = smat_ref[...]                        # [H*N, H]  S[h*N+j, h'] = (h == h')
    ones_nn = jnp.ones((N, N), jnp.float32)

    # ------------- Layer 1: GATConv(F_in -> C, heads=H, concat=True) -------------
    h = jnp.dot(x_ref[...], w1_ref[...], preferred_element_type=jnp.float32)   # [N, H*C]
    a_s = jnp.dot(h, asrc1_ref[...], preferred_element_type=jnp.float32)       # [N, H]
    a_d = jnp.dot(h, adst1_ref[...], preferred_element_type=jnp.float32)       # [N, H]

    # Lane-dense all-head logits e[i, h*N + j] = a_d[i, h] + a_s[j, h].
    dst_term = jnp.dot(a_d, R, preferred_element_type=jnp.float32)             # [N, H*N]
    src_sel = jnp.dot(a_s, R, preferred_element_type=jnp.float32) * M          # diag place
    src_term = jnp.dot(ones_nn, src_sel, preferred_element_type=jnp.float32)   # [N, H*N]
    e = dst_term + src_term
    e = jnp.where(e > 0, e, NEG_SLOPE * e)                                     # LeakyReLU
    adj_tiled = jnp.dot(adj, M, preferred_element_type=jnp.float32)            # [N, H*N]
    e = jnp.where(adj_tiled > 0.5, e, NEG_INF)

    # Masked softmax over sources, all heads at once.  A single per-row shift
    # (max over all H*N lanes) is constant within each head's segment, so the
    # softmax is unchanged; masked entries underflow exp() to exactly 0, so no
    # second mask on p is needed (every row has a self-loop).
    row_max = jnp.max(e, axis=1, keepdims=True)
    p = jnp.exp(e - row_max)
    denom = jnp.dot(p, S, preferred_element_type=jnp.float32)                  # [N, H]
    inv = 1.0 / jnp.maximum(denom, 1e-20)
    alpha = p * jnp.dot(inv, R, preferred_element_type=jnp.float32)            # [N, H*N]

    # Per-head aggregation on the MXU (it has plenty of slack at these shapes);
    # h1 assembled in registers -- no VMEM scratch, no narrow masked stores.
    head_outs = [
        jnp.dot(alpha[:, hd * N:(hd + 1) * N], h[:, hd * C:(hd + 1) * C],
                preferred_element_type=jnp.float32)
        for hd in range(H)]
    h1 = jnp.concatenate(head_outs, axis=1) + b1_ref[...]                      # [N, H*C]
    h1 = jnp.where(h1 > 0, h1, jnp.exp(jnp.minimum(h1, 0.0)) - 1.0)            # ELU
    # dropout: identity in eval mode

    # --------- Layer 2: GATConv(H*C -> num_classes, heads=1, concat=False) -------
    h2 = jnp.dot(h1, w2_ref[...], preferred_element_type=jnp.float32)          # [N, C2]
    a_s2 = jnp.dot(h2, asrc2_ref[...], preferred_element_type=jnp.float32)     # [N, 1]
    a_d2 = jnp.dot(h2, adst2_ref[...], preferred_element_type=jnp.float32)     # [N, 1]
    eye_n = M[:, :N]                                                           # [N, N] I
    src2 = jnp.dot(ones_nn, a_s2 * eye_n, preferred_element_type=jnp.float32)  # [N, N]
    e2 = a_d2 + src2
    e2 = jnp.where(e2 > 0, e2, NEG_SLOPE * e2)
    e2 = jnp.where(adj > 0.5, e2, NEG_INF)
    m2 = jnp.max(e2, axis=1, keepdims=True)
    p2 = jnp.exp(e2 - m2)
    den2 = jnp.maximum(jnp.sum(p2, axis=1, keepdims=True), 1e-20)
    alpha2 = p2 / den2
    # Single head => mean over heads is the head itself; bias after aggregation.
    out_ref[...] = jnp.dot(alpha2, h2, preferred_element_type=jnp.float32) + b2_ref[...]


def _block_diag_att(att):
    """att [H, C] -> block-diagonal [H*C, H] so that (h @ mat)[:, h] = h_head . att[h]."""
    H, C = att.shape
    eye = jnp.eye(H, dtype=att.dtype)
    return (att[:, :, None] * eye[:, None, :]).reshape(H * C, H)


def gat_forward(x, adj, params, *, heads, hidden_channels):
    N = x.shape[0]
    H = heads
    num_classes = params["w2"].shape[1]

    asrc1_mat = _block_diag_att(params["a_src1"])            # [H*C, H]
    adst1_mat = _block_diag_att(params["a_dst1"])            # [H*C, H]
    asrc2_mat = params["a_src2"].T                           # [C2, 1]
    adst2_mat = params["a_dst2"].T                           # [C2, 1]

    # Tiny static 0/1 layout matrices for the lane-dense batched-head softmax.
    cols = jnp.arange(H * N)
    rmat = (cols[None, :] // N == jnp.arange(H)[:, None]).astype(jnp.float32)  # [H, H*N]
    mmat = (cols[None, :] % N == jnp.arange(N)[:, None]).astype(jnp.float32)   # [N, H*N]
    smat = rmat.T                                                              # [H*N, H]

    kernel = functools.partial(fused_gat_kernel, heads=heads,
                               hidden=hidden_channels)
    vmem_spec = lambda: pl.BlockSpec(memory_space=pltpu.MemorySpace.VMEM)
    return pl.pallas_call(
        kernel,
        out_shape=jax.ShapeDtypeStruct((N, num_classes), jnp.float32),
        in_specs=[vmem_spec() for _ in range(13)],
        out_specs=vmem_spec(),
        compiler_params=pltpu.CompilerParams(
            vmem_limit_bytes=32 * 1024 * 1024),
    )(x, params["w1"], asrc1_mat, adst1_mat, params["b1"],
      params["w2"], asrc2_mat, adst2_mat, params["b2"], adj,
      rmat, mmat, smat)


def init_params(key, num_features, hidden_channels, num_classes, heads=8):
    ks = jax.random.split(key, 8)
    scale = 0.1
    return {
        # GATConv(num_features -> hidden_channels, heads=8, concat=True)
        "w1":     scale * jax.random.normal(ks[0], (num_features, heads * hidden_channels), jnp.float32),
        "a_src1": scale * jax.random.normal(ks[1], (heads, hidden_channels), jnp.float32),
        "a_dst1": scale * jax.random.normal(ks[2], (heads, hidden_channels), jnp.float32),
        "b1":     scale * jax.random.normal(ks[3], (1, heads * hidden_channels), jnp.float32),
        # GATConv(hidden_channels*8 -> num_classes, heads=1, concat=False)
        "w2":     scale * jax.random.normal(ks[4], (heads * hidden_channels, num_classes), jnp.float32),
        "a_src2": scale * jax.random.normal(ks[5], (1, num_classes), jnp.float32),
        "a_dst2": scale * jax.random.normal(ks[6], (1, num_classes), jnp.float32),
        "b2":     scale * jax.random.normal(ks[7], (1, num_classes), jnp.float32),
    }


def build_dense_adj(edge_index, num_nodes):
    """adj[target, source] = 1 for each edge (source -> target), plus self-loops."""
    src, tgt = edge_index[0], edge_index[1]
    adj = jnp.zeros((num_nodes, num_nodes), jnp.float32)
    adj = adj.at[tgt, src].set(1.0)
    idx = jnp.arange(num_nodes)
    adj = adj.at[idx, idx].set(1.0)       # add_self_loops=True (PyG default)
    return adj                            # TODO(synk): int8 / bit-packed mask at scale


if __name__ == "__main__":
    key = jax.random.PRNGKey(0)
    k_x, k_p = jax.random.split(key)

    N = 16                 # number of nodes
    num_features = 16
    hidden_channels = 8
    heads = 8              # H*N = 128 -> the batched softmax is exactly one vreg-row wide
    num_classes = 4

    # Node features.
    x = jax.random.normal(k_x, (N, num_features), jnp.float32)

    # Deterministic small graph: bidirectional ring + a few chords.
    idx = jnp.arange(N)
    src = jnp.concatenate([idx, (idx + 1) % N, idx[::2]])
    tgt = jnp.concatenate([(idx + 1) % N, idx, (idx[::2] + 5) % N])
    edge_index = jnp.stack([src, tgt]).astype(jnp.int32)   # [2, E]

    adj = build_dense_adj(edge_index, N)

    params = init_params(k_p, num_features, hidden_channels, num_classes, heads)

    out = gat_forward(x, adj, params, heads=heads,
                      hidden_channels=hidden_channels)
    out = jax.block_until_ready(out)

    assert out.shape == (N, num_classes), out.shape
    assert jnp.all(jnp.isfinite(out))
    print("KERNEL_OK")
</pallas_src>

<mosaic_0001>
module attributes {stable_mosaic.version = 11 : i64} {
  func.func @fused_gat_kernel(%arg0: memref<16x16xf32, #tpu.memory_space<vmem>>, %arg1: memref<16x64xf32, #tpu.memory_space<vmem>>, %arg2: memref<64x8xf32, #tpu.memory_space<vmem>>, %arg3: memref<64x8xf32, #tpu.memory_space<vmem>>, %arg4: memref<1x64xf32, #tpu.memory_space<vmem>>, %arg5: memref<64x4xf32, #tpu.memory_space<vmem>>, %arg6: memref<4x1xf32, #tpu.memory_space<vmem>>, %arg7: memref<4x1xf32, #tpu.memory_space<vmem>>, %arg8: memref<1x4xf32, #tpu.memory_space<vmem>>, %arg9: memref<16x16xf32, #tpu.memory_space<vmem>>, %arg10: memref<8x128xf32, #tpu.memory_space<vmem>>, %arg11: memref<16x128xf32, #tpu.memory_space<vmem>>, %arg12: memref<128x8xf32, #tpu.memory_space<vmem>>, %arg13: memref<16x4xf32, #tpu.memory_space<vmem>>) attributes {dimension_semantics = [], scalar_prefetch = 0 : i64, scratch_operands = 0 : i64, tpu.core_type = #tpu.core_type<tc>} {
    %c0 = arith.constant 0 : index
    %c0_0 = arith.constant 0 : index
    %0 = vector.load %arg9[%c0, %c0_0] : memref<16x16xf32, #tpu.memory_space<vmem>>, vector<16x16xf32>
    %c0_1 = arith.constant 0 : index
    %c0_2 = arith.constant 0 : index
    %1 = vector.load %arg10[%c0_1, %c0_2] : memref<8x128xf32, #tpu.memory_space<vmem>>, vector<8x128xf32>
    %c0_3 = arith.constant 0 : index
    %c0_4 = arith.constant 0 : index
    %2 = vector.load %arg11[%c0_3, %c0_4] : memref<16x128xf32, #tpu.memory_space<vmem>>, vector<16x128xf32>
    %c0_5 = arith.constant 0 : index
    %c0_6 = arith.constant 0 : index
    %3 = vector.load %arg12[%c0_5, %c0_6] : memref<128x8xf32, #tpu.memory_space<vmem>>, vector<128x8xf32>
    %cst = arith.constant 1.000000e+00 : f32
    %4 = vector.broadcast %cst : f32 to vector<16x16xf32>
    %c0_7 = arith.constant 0 : index
    %c0_8 = arith.constant 0 : index
    %5 = vector.load %arg0[%c0_7, %c0_8] : memref<16x16xf32, #tpu.memory_space<vmem>>, vector<16x16xf32>
    %c0_9 = arith.constant 0 : index
    %c0_10 = arith.constant 0 : index
    %6 = vector.load %arg1[%c0_9, %c0_10] : memref<16x64xf32, #tpu.memory_space<vmem>>, vector<16x64xf32>
    %cst_11 = arith.constant dense<0.000000e+00> : vector<16x64xf32>
    %7 = tpu.matmul %5, %6, %cst_11 {dimension_numbers = #tpu.dot_dimension_numbers<[1], [0], [0], [1], [0, 0, 1, 1], [], []>} : vector<16x16xf32>, vector<16x64xf32>, vector<16x64xf32> -> vector<16x64xf32>
    %c0_12 = arith.constant 0 : index
    %c0_13 = arith.constant 0 : index
    %8 = vector.load %arg2[%c0_12, %c0_13] : memref<64x8xf32, #tpu.memory_space<vmem>>, vector<64x8xf32>
    %cst_14 = arith.constant dense<0.000000e+00> : vector<16x8xf32>
    %9 = tpu.matmul %7, %8, %cst_14 {dimension_numbers = #tpu.dot_dimension_numbers<[1], [0], [0], [1], [0, 0, 1, 1], [], []>} : vector<16x64xf32>, vector<64x8xf32>, vector<16x8xf32> -> vector<16x8xf32>
    %c0_15 = arith.constant 0 : index
    %c0_16 = arith.constant 0 : index
    %10 = vector.load %arg3[%c0_15, %c0_16] : memref<64x8xf32, #tpu.memory_space<vmem>>, vector<64x8xf32>
    %cst_17 = arith.constant dense<0.000000e+00> : vector<16x8xf32>
    %11 = tpu.matmul %7, %10, %cst_17 {dimension_numbers = #tpu.dot_dimension_numbers<[1], [0], [0], [1], [0, 0, 1, 1], [], []>} : vector<16x64xf32>, vector<64x8xf32>, vector<16x8xf32> -> vector<16x8xf32>
    %cst_18 = arith.constant dense<0.000000e+00> : vector<16x128xf32>
    %12 = tpu.matmul %11, %1, %cst_18 {dimension_numbers = #tpu.dot_dimension_numbers<[1], [0], [0], [1], [0, 0, 1, 1], [], []>} : vector<16x8xf32>, vector<8x128xf32>, vector<16x128xf32> -> vector<16x128xf32>
    %cst_19 = arith.constant dense<0.000000e+00> : vector<16x128xf32>
    %13 = tpu.matmul %9, %1, %cst_19 {dimension_numbers = #tpu.dot_dimension_numbers<[1], [0], [0], [1], [0, 0, 1, 1], [], []>} : vector<16x8xf32>, vector<8x128xf32>, vector<16x128xf32> -> vector<16x128xf32>
    %14 = arith.mulf %13, %2 : vector<16x128xf32>
    %cst_20 = arith.constant dense<0.000000e+00> : vector<16x128xf32>
    %15 = tpu.matmul %4, %14, %cst_20 {dimension_numbers = #tpu.dot_dimension_numbers<[1], [0], [0], [1], [0, 0, 1, 1], [], []>} : vector<16x16xf32>, vector<16x128xf32>, vector<16x128xf32> -> vector<16x128xf32>
    %16 = arith.addf %12, %15 : vector<16x128xf32>
    %cst_21 = arith.constant 0.000000e+00 : f32
    %17 = vector.broadcast %cst_21 : f32 to vector<16x128xf32>
    %18 = arith.cmpf ogt, %16, %17 : vector<16x128xf32>
    %cst_22 = arith.constant 2.000000e-01 : f32
    %19 = vector.broadcast %cst_22 : f32 to vector<16x128xf32>
    %20 = arith.mulf %19, %16 : vector<16x128xf32>
    %21 = arith.select %18, %16, %20 : vector<16x128xi1>, vector<16x128xf32>
    %cst_23 = arith.constant dense<0.000000e+00> : vector<16x128xf32>
    %22 = tpu.matmul %0, %2, %cst_23 {dimension_numbers = #tpu.dot_dimension_numbers<[1], [0], [0], [1], [0, 0, 1, 1], [], []>} : vector<16x16xf32>, vector<16x128xf32>, vector<16x128xf32> -> vector<16x128xf32>
    %cst_24 = arith.constant 5.000000e-01 : f32
    %23 = vector.broadcast %cst_24 : f32 to vector<16x128xf32>
    %24 = arith.cmpf ogt, %22, %23 : vector<16x128xf32>
    %cst_25 = arith.constant -1.000000e+30 : f32
    %25 = vector.broadcast %cst_25 : f32 to vector<16x128xf32>
    %26 = arith.select %24, %21, %25 : vector<16x128xi1>, vector<16x128xf32>
    %cst_26 = arith.constant dense<0xFF800000> : vector<16xf32>
    %27 = vector.multi_reduction <maximumf>, %26, %cst_26 [1] : vector<16x128xf32> to vector<16xf32>
    %28 = vector.shape_cast %27 : vector<16xf32> to vector<16x1xf32>
    %29 = vector.broadcast %28 : vector<16x1xf32> to vector<16x128xf32>
    %30 = arith.subf %26, %29 : vector<16x128xf32>
    %31 = math.exp %30 : vector<16x128xf32>
    %cst_27 = arith.constant dense<0.000000e+00> : vector<16x8xf32>
    %32 = tpu.matmul %31, %3, %cst_27 {dimension_numbers = #tpu.dot_dimension_numbers<[1], [0], [0], [1], [0, 0, 1, 1], [], []>} : vector<16x128xf32>, vector<128x8xf32>, vector<16x8xf32> -> vector<16x8xf32>
    %cst_28 = arith.constant 9.99999968E-21 : f32
    %33 = vector.broadcast %cst_28 : f32 to vector<16x8xf32>
    %34 = arith.maximumf %32, %33 : vector<16x8xf32>
    %cst_29 = arith.constant 1.000000e+00 : f32
    %35 = vector.broadcast %cst_29 : f32 to vector<16x8xf32>
    %36 = arith.divf %35, %34 : vector<16x8xf32>
    %cst_30 = arith.constant dense<0.000000e+00> : vector<16x128xf32>
    %37 = tpu.matmul %36, %1, %cst_30 {dimension_numbers = #tpu.dot_dimension_numbers<[1], [0], [0], [1], [0, 0, 1, 1], [], []>} : vector<16x8xf32>, vector<8x128xf32>, vector<16x128xf32> -> vector<16x128xf32>
    %38 = arith.mulf %31, %37 : vector<16x128xf32>
    %39 = vector.extract_strided_slice %38 {offsets = [0, 0], sizes = [16, 16], strides = [1, 1]} : vector<16x128xf32> to vector<16x16xf32>
    %40 = vector.extract_strided_slice %7 {offsets = [0, 0], sizes = [16, 8], strides = [1, 1]} : vector<16x64xf32> to vector<16x8xf32>
    %cst_31 = arith.constant dense<0.000000e+00> : vector<16x8xf32>
    %41 = tpu.matmul %39, %40, %cst_31 {dimension_numbers = #tpu.dot_dimension_numbers<[1], [0], [0], [1], [0, 0, 1, 1], [], []>} : vector<16x16xf32>, vector<16x8xf32>, vector<16x8xf32> -> vector<16x8xf32>
    %42 = vector.extract_strided_slice %38 {offsets = [0, 16], sizes = [16, 16], strides = [1, 1]} : vector<16x128xf32> to vector<16x16xf32>
    %43 = vector.extract_strided_slice %7 {offsets = [0, 8], sizes = [16, 8], strides = [1, 1]} : vector<16x64xf32> to vector<16x8xf32>
    %cst_32 = arith.constant dense<0.000000e+00> : vector<16x8xf32>
    %44 = tpu.matmul %42, %43, %cst_32 {dimension_numbers = #tpu.dot_dimension_numbers<[1], [0], [0], [1], [0, 0, 1, 1], [], []>} : vector<16x16xf32>, vector<16x8xf32>, vector<16x8xf32> -> vector<16x8xf32>
    %45 = vector.extract_strided_slice %38 {offsets = [0, 32], sizes = [16, 16], strides = [1, 1]} : vector<16x128xf32> to vector<16x16xf32>
    %46 = vector.extract_strided_slice %7 {offsets = [0, 16], sizes = [16, 8], strides = [1, 1]} : vector<16x64xf32> to vector<16x8xf32>
    %cst_33 = arith.constant dense<0.000000e+00> : vector<16x8xf32>
    %47 = tpu.matmul %45, %46, %cst_33 {dimension_numbers = #tpu.dot_dimension_numbers<[1], [0], [0], [1], [0, 0, 1, 1], [], []>} : vector<16x16xf32>, vector<16x8xf32>, vector<16x8xf32> -> vector<16x8xf32>
    %48 = vector.extract_strided_slice %38 {offsets = [0, 48], sizes = [16, 16], strides = [1, 1]} : vector<16x128xf32> to vector<16x16xf32>
    %49 = vector.extract_strided_slice %7 {offsets = [0, 24], sizes = [16, 8], strides = [1, 1]} : vector<16x64xf32> to vector<16x8xf32>
    %cst_34 = arith.constant dense<0.000000e+00> : vector<16x8xf32>
    %50 = tpu.matmul %48, %49, %cst_34 {dimension_numbers = #tpu.dot_dimension_numbers<[1], [0], [0], [1], [0, 0, 1, 1], [], []>} : vector<16x16xf32>, vector<16x8xf32>, vector<16x8xf32> -> vector<16x8xf32>
    %51 = vector.extract_strided_slice %38 {offsets = [0, 64], sizes = [16, 16], strides = [1, 1]} : vector<16x128xf32> to vector<16x16xf32>
    %52 = vector.extract_strided_slice %7 {offsets = [0, 32], sizes = [16, 8], strides = [1, 1]} : vector<16x64xf32> to vector<16x8xf32>
    %cst_35 = arith.constant dense<0.000000e+00> : vector<16x8xf32>
    %53 = tpu.matmul %51, %52, %cst_35 {dimension_numbers = #tpu.dot_dimension_numbers<[1], [0], [0], [1], [0, 0, 1, 1], [], []>} : vector<16x16xf32>, vector<16x8xf32>, vector<16x8xf32> -> vector<16x8xf32>
    %54 = vector.extract_strided_slice %38 {offsets = [0, 80], sizes = [16, 16], strides = [1, 1]} : vector<16x128xf32> to vector<16x16xf32>
    %55 = vector.extract_strided_slice %7 {offsets = [0, 40], sizes = [16, 8], strides = [1, 1]} : vector<16x64xf32> to vector<16x8xf32>
    %cst_36 = arith.constant dense<0.000000e+00> : vector<16x8xf32>
    %56 = tpu.matmul %54, %55, %cst_36 {dimension_numbers = #tpu.dot_dimension_numbers<[1], [0], [0], [1], [0, 0, 1, 1], [], []>} : vector<16x16xf32>, vector<16x8xf32>, vector<16x8xf32> -> vector<16x8xf32>
    %57 = vector.extract_strided_slice %38 {offsets = [0, 96], sizes = [16, 16], strides = [1, 1]} : vector<16x128xf32> to vector<16x16xf32>
    %58 = vector.extract_strided_slice %7 {offsets = [0, 48], sizes = [16, 8], strides = [1, 1]} : vector<16x64xf32> to vector<16x8xf32>
    %cst_37 = arith.constant dense<0.000000e+00> : vector<16x8xf32>
    %59 = tpu.matmul %57, %58, %cst_37 {dimension_numbers = #tpu.dot_dimension_numbers<[1], [0], [0], [1], [0, 0, 1, 1], [], []>} : vector<16x16xf32>, vector<16x8xf32>, vector<16x8xf32> -> vector<16x8xf32>
    %60 = vector.extract_strided_slice %38 {offsets = [0, 112], sizes = [16, 16], strides = [1, 1]} : vector<16x128xf32> to vector<16x16xf32>
    %61 = vector.extract_strided_slice %7 {offsets = [0, 56], sizes = [16, 8], strides = [1, 1]} : vector<16x64xf32> to vector<16x8xf32>
    %cst_38 = arith.constant dense<0.000000e+00> : vector<16x8xf32>
    %62 = tpu.matmul %60, %61, %cst_38 {dimension_numbers = #tpu.dot_dimension_numbers<[1], [0], [0], [1], [0, 0, 1, 1], [], []>} : vector<16x16xf32>, vector<16x8xf32>, vector<16x8xf32> -> vector<16x8xf32>
    %63 = tpu.concatenate %41, %44, %47, %50, %53, %56, %59, %62 in 1 : vector<16x8xf32>, vector<16x8xf32>, vector<16x8xf32>, vector<16x8xf32>, vector<16x8xf32>, vector<16x8xf32>, vector<16x8xf32>, vector<16x8xf32> -> vector<16x64xf32>
    %c0_39 = arith.constant 0 : index
    %c0_40 = arith.constant 0 : index
    %64 = vector.load %arg4[%c0_39, %c0_40] : memref<1x64xf32, #tpu.memory_space<vmem>>, vector<1x64xf32>
    %65 = vector.broadcast %64 : vector<1x64xf32> to vector<16x64xf32>
    %66 = arith.addf %63, %65 : vector<16x64xf32>
    %cst_41 = arith.constant 0.000000e+00 : f32
    %67 = vector.broadcast %cst_41 : f32 to vector<16x64xf32>
    %68 = arith.cmpf ogt, %66, %67 : vector<16x64xf32>
    %cst_42 = arith.constant 0.000000e+00 : f32
    %69 = vector.broadcast %cst_42 : f32 to vector<16x64xf32>
    %70 = arith.minimumf %66, %69 : vector<16x64xf32>
    %71 = math.exp %70 : vector<16x64xf32>
    %cst_43 = arith.constant 1.000000e+00 : f32
    %72 = vector.broadcast %cst_43 : f32 to vector<16x64xf32>
    %73 = arith.subf %71, %72 : vector<16x64xf32>
    %74 = arith.select %68, %66, %73 : vector<16x64xi1>, vector<16x64xf32>
    %c0_44 = arith.constant 0 : index
    %c0_45 = arith.constant 0 : index
    %75 = vector.load %arg5[%c0_44, %c0_45] : memref<64x4xf32, #tpu.memory_space<vmem>>, vector<64x4xf32>
    %cst_46 = arith.constant dense<0.000000e+00> : vector<16x4xf32>
    %76 = tpu.matmul %74, %75, %cst_46 {dimension_numbers = #tpu.dot_dimension_numbers<[1], [0], [0], [1], [0, 0, 1, 1], [], []>} : vector<16x64xf32>, vector<64x4xf32>, vector<16x4xf32> -> vector<16x4xf32>
    %c0_47 = arith.constant 0 : index
    %c0_48 = arith.constant 0 : index
    %77 = vector.load %arg6[%c0_47, %c0_48] : memref<4x1xf32, #tpu.memory_space<vmem>>, vector<4x1xf32>
    %cst_49 = arith.constant dense<0.000000e+00> : vector<16x1xf32>
    %78 = tpu.matmul %76, %77, %cst_49 {dimension_numbers = #tpu.dot_dimension_numbers<[1], [0], [0], [1], [0, 0, 1, 1], [], []>} : vector<16x4xf32>, vector<4x1xf32>, vector<16x1xf32> -> vector<16x1xf32>
    %c0_50 = arith.constant 0 : index
    %c0_51 = arith.constant 0 : index
    %79 = vector.load %arg7[%c0_50, %c0_51] : memref<4x1xf32, #tpu.memory_space<vmem>>, vector<4x1xf32>
    %cst_52 = arith.constant dense<0.000000e+00> : vector<16x1xf32>
    %80 = tpu.matmul %76, %79, %cst_52 {dimension_numbers = #tpu.dot_dimension_numbers<[1], [0], [0], [1], [0, 0, 1, 1], [], []>} : vector<16x4xf32>, vector<4x1xf32>, vector<16x1xf32> -> vector<16x1xf32>
    %81 = vector.extract_strided_slice %2 {offsets = [0, 0], sizes = [16, 16], strides = [1, 1]} : vector<16x128xf32> to vector<16x16xf32>
    %82 = vector.broadcast %78 : vector<16x1xf32> to vector<16x16xf32>
    %83 = arith.mulf %82, %81 : vector<16x16xf32>
    %cst_53 = arith.constant dense<0.000000e+00> : vector<16x16xf32>
    %84 = tpu.matmul %4, %83, %cst_53 {dimension_numbers = #tpu.dot_dimension_numbers<[1], [0], [0], [1], [0, 0, 1, 1], [], []>} : vector<16x16xf32>, vector<16x16xf32>, vector<16x16xf32> -> vector<16x16xf32>
    %85 = vector.broadcast %80 : vector<16x1xf32> to vector<16x16xf32>
    %86 = arith.addf %85, %84 : vector<16x16xf32>
    %cst_54 = arith.constant 0.000000e+00 : f32
    %87 = vector.broadcast %cst_54 : f32 to vector<16x16xf32>
    %88 = arith.cmpf ogt, %86, %87 : vector<16x16xf32>
    %cst_55 = arith.constant 2.000000e-01 : f32
    %89 = vector.broadcast %cst_55 : f32 to vector<16x16xf32>
    %90 = arith.mulf %89, %86 : vector<16x16xf32>
    %91 = arith.select %88, %86, %90 : vector<16x16xi1>, vector<16x16xf32>
    %cst_56 = arith.constant 5.000000e-01 : f32
    %92 = vector.broadcast %cst_56 : f32 to vector<16x16xf32>
    %93 = arith.cmpf ogt, %0, %92 : vector<16x16xf32>
    %cst_57 = arith.constant -1.000000e+30 : f32
    %94 = vector.broadcast %cst_57 : f32 to vector<16x16xf32>
    %95 = arith.select %93, %91, %94 : vector<16x16xi1>, vector<16x16xf32>
    %cst_58 = arith.constant dense<0xFF800000> : vector<16xf32>
    %96 = vector.multi_reduction <maximumf>, %95, %cst_58 [1] : vector<16x16xf32> to vector<16xf32>
    %97 = vector.shape_cast %96 : vector<16xf32> to vector<16x1xf32>
    %98 = vector.broadcast %97 : vector<16x1xf32> to vector<16x16xf32>
    %99 = arith.subf %95, %98 : vector<16x16xf32>
    %100 = math.exp %99 : vector<16x16xf32>
    %cst_59 = arith.constant dense<0.000000e+00> : vector<16xf32>
    %101 = vector.multi_reduction <add>, %100, %cst_59 [1] : vector<16x16xf32> to vector<16xf32>
    %102 = vector.shape_cast %101 : vector<16xf32> to vector<16x1xf32>
    %cst_60 = arith.constant 9.99999968E-21 : f32
    %103 = vector.broadcast %cst_60 : f32 to vector<16x1xf32>
    %104 = arith.maximumf %102, %103 : vector<16x1xf32>
    %105 = vector.broadcast %104 : vector<16x1xf32> to vector<16x16xf32>
    %106 = arith.divf %100, %105 : vector<16x16xf32>
    %cst_61 = arith.constant dense<0.000000e+00> : vector<16x4xf32>
    %107 = tpu.matmul %106, %76, %cst_61 {dimension_numbers = #tpu.dot_dimension_numbers<[1], [0], [0], [1], [0, 0, 1, 1], [], []>} : vector<16x16xf32>, vector<16x4xf32>, vector<16x4xf32> -> vector<16x4xf32>
    %c0_62 = arith.constant 0 : index
    %c0_63 = arith.constant 0 : index
    %108 = vector.load %arg8[%c0_62, %c0_63] : memref<1x4xf32, #tpu.memory_space<vmem>>, vector<1x4xf32>
    %109 = vector.broadcast %108 : vector<1x4xf32> to vector<16x4xf32>
    %110 = arith.addf %107, %109 : vector<16x4xf32>
    %c0_64 = arith.constant 0 : index
    %c0_65 = arith.constant 0 : index
    %111 = vector.load %arg13[%c0_64, %c0_65] : memref<16x4xf32, #tpu.memory_space<vmem>>, vector<16x4xf32>
    tpu.vector_store %arg13[%c0_64, %c0_65], %110 {strides = array<i32>} : memref<16x4xf32, #tpu.memory_space<vmem>>, vector<16x4xf32>,
    return
  }
}

</mosaic_0001>

<bundles_post_ra>
// kernel: tpu_custom_call.1
= control target key start
LH: loop header
LB: loop body
LE: loop exit
PB: predicated region body
PF: predicated region fallthrough
CT: control target
= control target key end

     0   :  { %vm69_vm0 = vcmask 130048   ;;  %vm159_vm1 = vcmask 523264   ;;  %s2694_s29 = smov 112   ;;  %s2695_s30 = smov 104   ;;  %vm324_vm2 = vcmask 64512   ;;  %v2697_v38 = vmov 1.0   ;;  %s3060_s1 = inlined_call_operand.vmem [shape: f32[16,64], index: 1, kind: input, shape index: {}]   ;;  %s3061_s0 = inlined_call_operand.vmem [shape: f32[16,16], index: 0, kind: input, shape index: {}]   ;;  %s3062_s2 = inlined_call_operand.vmem [shape: f32[64,8], index: 2, kind: input, shape index: {}]   ;;  %s3063_s3 = inlined_call_operand.vmem [shape: f32[64,8], index: 3, kind: input, shape index: {}]   ;;  %s3064_s10 = inlined_call_operand.vmem [shape: f32[8,128], index: 10, kind: input, shape index: {}]   ;;  %s3065_s11 = inlined_call_operand.vmem [shape: f32[16,128], index: 11, kind: input, shape index: {}]   ;;  %s3066_s9 = inlined_call_operand.vmem [shape: f32[16,16], index: 9, kind: input, shape index: {}]   ;;  %s3067_s12 = inlined_call_operand.vmem [shape: f32[128,8], index: 12, kind: input, shape index: {}]   ;;  %s3068_s5 = inlined_call_operand.vmem [shape: f32[64,4], index: 5, kind: input, shape index: {}]   ;;  %s3069_s6 = inlined_call_operand.vmem [shape: f32[4,1], index: 6, kind: input, shape index: {}]   ;;  %s3070_s4 = inlined_call_operand.vmem [shape: f32[1,64], index: 4, kind: input, shape index: {}]   ;;  %s3071_s7 = inlined_call_operand.vmem [shape: f32[4,1], index: 7, kind: input, shape index: {}]   ;;  %s3072_s8 = inlined_call_operand.vmem [shape: f32[1,4], index: 8, kind: input, shape index: {}]   ;;  %s3073_s13 = inlined_call_operand.vmem [shape: f32[16,4], index: 13, kind: output, shape index: {}]  }
   0x1   :  { %v67_v0 = vld [vmem:[%s3060_s1] sm:$0xff]  ;;  %v68_v1 = vld [vmem:[%s3060_s1 + $0x8] sm:$0xff]  ;;  %v153_v9 = vld [vmem:[%s3062_s2 + $0x10] sm:$0xff]  ;;  %s2696_s14 = smov 96   ;;  %s2702_s28 = smov 32   ;;  %vm1729_vm7 = vcmask 1043456  }
   0x2   :  { %v65_v2 = vld [vmem:[%s3061_s0] sm:$0xff]  ;;  %v2485_v3 = vpack.c.bf16 %v68_v1, %v67_v0  ;;  %v152_v5 = vld [vmem:[%s3062_s2 + $0x8] sm:$0xff]  ;;  %v154_v11 = vld [vmem:[%s3062_s2 + $0x18] sm:$0xff]  ;;  %s2706_s15 = smov 24   ;;  %s2707_s16 = smov 40   ;;  %vm1596_vm8 = vcmask 195584  }
   0x3   :  { %2281 = vmatprep.mubr.msk.f32.mxu0 %vm69_vm0, %v65_v2  ;;  %v151_v4 = vld [vmem:[%s3062_s2] sm:$0xff]  ;;  %v242_v8 = vld [vmem:[%s3063_s3 + $0x8] sm:$0xff]  ;;  %v243_v12 = vld [vmem:[%s3063_s3 + $0x10] sm:$0xff]  ;;  %v2493_v15 = vpack.c.bf16 %v154_v11, %v153_v9  ;;  %vm1599_vm9 = vcmask 261120   ;;  %vm1602_vm10 = vcmask 326656   ;;  %vm1605_vm11 = vcmask 392192  }
   0x4   :  { %v2489_v6 = vpack.c.bf16 %v152_v5, %v151_v4  ;;  %v241_v7 = vld [vmem:[%s3063_s3] sm:$0xff]  ;;  %2486 = vmatprep.subr.bf16.mxu0 %v2485_v3  ;;  %v244_v13 = vld [vmem:[%s3063_s3 + $0x18] sm:$0xff]  ;;  %v66_v14 = vld [vmem:[%s3061_s0 + $0x8] sm:$0xff]  ;;  %vm1608_vm12 = vcmask 457728   ;;  %vm1722_vm15 = vcmask 31744  }
   0x5   :  { %v2505_v10 = vpack.c.bf16 %v242_v8, %v241_v7  ;;  %2488 = vmatpush3.bf16.msra.mxu0 %v2485_v3  ;;  %v155_v16 = vld [vmem:[%s3062_s2 + $0x20] sm:$0xff]  ;;  %v156_v17 = vld [vmem:[%s3062_s2 + $0x28] sm:$0xff]  ;;  %v2509_v18 = vpack.c.bf16 %v244_v13, %v243_v12  ;;  %v157_v22 = vld [vmem:[%s3062_s2 + $0x30] sm:$0xff] }
   0x6   :  { %2490 = vmatprep.subr.bf16.mxu1 %v2489_v6  ;;  %v2497_v19 = vpack.c.bf16 %v156_v17, %v155_v16  ;;  %v245_v20 = vld [vmem:[%s3063_s3 + $0x20] sm:$0xff]  ;;  %v246_v21 = vld [vmem:[%s3063_s3 + $0x28] sm:$0xff]  ;;  %v158_v23 = vld [vmem:[%s3062_s2 + $0x38] sm:$0xff]  ;;  %s2693_s2 = smov 120  }
   0x7   :  { %2506 = vmatprep.subr.bf16.mxu0 %v2505_v10  ;;  %2492 = vmatpush3.bf16.msra.mxu1 %v2489_v6  ;;  %v2513_v24 = vpack.c.bf16 %v246_v21, %v245_v20  ;;  %v2501_v25 = vpack.c.bf16 %v158_v23, %v157_v22  ;;  %v247_v26 = vld [vmem:[%s3063_s3 + $0x30] sm:$0xff]  ;;  %v248_v27 = vld [vmem:[%s3063_s3 + $0x38] sm:$0xff]  ;;  %v46_v33 = vld [vmem:[%s3064_s10] sm:$0xff]  ;;  %s2700_s3 = smov 64   ;;  %s2704_s10 = smov 16  }
   0x8   :  { %2494 = vmatprep.subr.bf16.mxu1 %v2493_v15  ;;  %2282 = vmatmul.mubr.msk.f32.vlgmr.msra.gmra.mrb[0].mxu0 %vm69_vm0, %v66_v14  ;;  %v2517_v28 = vpack.c.bf16 %v248_v27, %v247_v26  ;;  %v2866_v39 = vld [vmem:[%s3065_s11 + $0x8] sm:$0xff]  ;;  %v2871_v40 = vld [vmem:[%s3065_s11] sm:$0xff]  ;;  %v51_v53 = vld [vmem:[%s3067_s12 + $0x10] sm:$0xff] }
   0x9   :  { %2508 = vmatpush3.bf16.msra.mxu0 %v2505_v10  ;;  %v2525_v41 = vpack.c.bf16 %v2866_v39, %v2871_v40  ;;  %v2878_v42 = vld [vmem:[%s3066_s9] sm:$0xff]  ;;  %v2883_v43 = vld [vmem:[%s3066_s9 + $0x8] sm:$0xff]  ;;  %v52_v55 = vld [vmem:[%s3067_s12 + $0x18] sm:$0xff] }
   0xa   :  { %2510 = vmatprep.subr.bf16.mxu0 %v2509_v18  ;;  %v49_v51 = vld [vmem:[%s3067_s12] sm:$0xff]  ;;  %v50_v52 = vld [vmem:[%s3067_s12 + $0x8] sm:$0xff]  ;;  %v2533_v56 = vpack.c.bf16 %v52_v55, %v51_v53  ;;  %v55_v60 = vld [vmem:[%s3067_s12 + $0x30] sm:$0xff] }
   0xb   :  { %2496 = vmatpush3.bf16.msra.mxu1 %v2493_v15  ;;  %v2529_v54 = vpack.c.bf16 %v50_v52, %v49_v51  ;;  %v53_v57 = vld [vmem:[%s3067_s12 + $0x20] sm:$0xff]  ;;  %v54_v58 = vld [vmem:[%s3067_s12 + $0x28] sm:$0xff]  ;;  %v56_v61 = vld [vmem:[%s3067_s12 + $0x38] sm:$0xff] }
   0xc   :  { %2498 = vmatprep.subr.bf16.mxu1 %v2497_v19  ;;  %v2537_v59 = vpack.c.bf16 %v54_v58, %v53_v57  ;;  %v2541_v62 = vpack.c.bf16 %v56_v61, %v55_v60  ;;  %v57_v7 = vld [vmem:[%s3067_s12 + $0x40] sm:$0xff]  ;;  %v58_v8 = vld [vmem:[%s3067_s12 + $0x48] sm:$0xff]  ;;  %v59_v10 = vld [vmem:[%s3067_s12 + $0x50] sm:$0xff] }
   0xd   :  { %2512 = vmatpush3.bf16.msra.mxu0 %v2509_v18  ;;  %v2545_v9 = vpack.c.bf16 %v58_v8, %v57_v7  ;;  %v60_v11 = vld [vmem:[%s3067_s12 + $0x58] sm:$0xff]  ;;  %v61_v13 = vld [vmem:[%s3067_s12 + $0x60] sm:$0xff]  ;;  %v62_v14 = vld [vmem:[%s3067_s12 + $0x68] sm:$0xff] }
   0xe   :  { %2514 = vmatprep.subr.bf16.mxu0 %v2513_v24  ;;  %v2549_v12 = vpack.c.bf16 %v60_v11, %v59_v10  ;;  %v63_v15 = vld [vmem:[%s3067_s12 + $0x70] sm:$0xff]  ;;  %v2553_v16 = vpack.c.bf16 %v62_v14, %v61_v13  ;;  %v64_v17 = vld [vmem:[%s3067_s12 + $0x78] sm:$0xff]  ;;  %s2698_s12 = smov 80  }
   0xf   :  { %2500 = vmatpush3.bf16.msra.mxu1 %v2497_v19  ;;  %v2557_v18 = vpack.c.bf16 %v64_v17, %v63_v15 }
  0x10   :  { %2502 = vmatprep.subr.bf16.mxu1 %v2501_v25 }
  0x11   :  { %2516 = vmatpush3.bf16.msra.mxu0 %v2513_v24 }
  0x12   :  { %2518 = vmatprep.subr.bf16.mxu0 %v2517_v28 }
  0x13   :  { %2504 = vmatpush3.bf16.msra.mxu1 %v2501_v25 }
  0x14   :  { %2322 = vmatprep.subr.mxu1 %v46_v33 }
  0x15   :  { %2520 = vmatpush3.bf16.msra.mxu0 %v2517_v28 }
  0xdb   :  { %v2283_v29 = vpop.f32.mrb[0].mxu0 }
  0xdc   :  { %v142_v30 = vpop.f32.mrb[1].mxu0 }
  0xdd   :  { %2300 = vmatprep.mubr.msk.f32.mxu1 %vm159_vm1, %v142_v30  ;;  %2319 = vmatprep.mubr.msk.f32.mxu0 %vm159_vm1, %v142_v30  ;;  %v2844_v31 = vpack.i.bf16 %v2283_v29, %v142_v30  ;;  %v2848_v32 = vpack.c.bf16 %v2283_v29, %v142_v30 }
  0xde   :  { %2301 = vmatmul.mubr.msk.f32.vlgmr.msra.gmra.mrb[0].mxu1 %vm159_vm1, %v2283_v29  ;;  %2320 = vmatmul.mubr.msk.f32.vlgmr.msra.gmra.mrb[2].mxu0 %vm159_vm1, %v2283_v29 }
  0xdf   :  { %2637 = vrot.lane.b32.xlu1 %v2844_v31, %s2693_s2  ;;  %2323 = vmatpush3.msra.mxu1 %v46_v33  ;;  %s2699_s2 = smov 88  }
  0xe0   :  { %2331 = vmatprep.mubr.msk.f32.mxu0 %vm69_vm0, %v2697_v38  ;;  %2526 = vmatprep.subr.bf16.mxu1 %v2525_v41 }
  0xe3   :  { %2642 = vrot.lane.b32.xlu1 %v2844_v31, %s2694_s29 }
  0xe7   :  { %2647 = vrot.lane.b32.xlu1 %v2844_v31, %s2695_s30  ;;  %s2703_s30 = smov 48  }
  0xeb   :  { %2652 = vrot.lane.b32.xlu1 %v2844_v31, %s2696_s14 }
 0x1b1   :  { %v2302_v34 = vpop.f32.mrb[0].mxu1  ;;  %v2321_v35 = vpop.f32.mrb[2].mxu0 }
 0x1b2   :  { %v232_v36 = vpop.f32.mrb[1].mxu1  ;;  %v315_v37 = vpop.f32.mrb[3].mxu0 }
 0x1b3   :  { %2324 = vmatprep.mubr.msk.f32.mxu1 %vm324_vm2, %v232_v36 }
 0x1b4   :  { %2325 = vmatmul.mubr.msk.f32.vlgmr.msra.gmra.mrb[2].mxu1 %vm324_vm2, %v2302_v34 }
 0x1b5   :  { %2528 = vmatpush3.bf16.msra.mxu1 %v2525_v41  ;;  %2343 = vmatprep.mubr.msk.f32.mxu1 %vm69_vm0, %v2878_v42 }
 0x1b6   :  { %2530 = vmatprep.subr.bf16.mxu1 %v2529_v54 }
 0x1b8   :  { %2344 = vmatmul.mubr.msk.f32.vlgmr.msra.gmra.mrb[4].mxu1 %vm69_vm0, %v2883_v43 }
 0x1b9   :  { %2532 = vmatpush3.bf16.msra.mxu1 %v2529_v54 }
 0x1ba   :  { %2534 = vmatprep.subr.bf16.mxu1 %v2533_v56 }
 0x1bd   :  { %2536 = vmatpush3.bf16.msra.mxu1 %v2533_v56 }
 0x1be   :  { %2538 = vmatprep.subr.bf16.mxu1 %v2537_v59 }
 0x1c1   :  { %2540 = vmatpush3.bf16.msra.mxu1 %v2537_v59 }
 0x1c2   :  { %2542 = vmatprep.subr.bf16.mxu1 %v2541_v62 }
 0x1c5   :  { %2544 = vmatpush3.bf16.msra.mxu1 %v2541_v62 }
 0x1c6   :  { %2546 = vmatprep.subr.bf16.mxu1 %v2545_v9 }
 0x1c9   :  { %2548 = vmatpush3.bf16.msra.mxu1 %v2545_v9 }
 0x1ca   :  { %2550 = vmatprep.subr.bf16.mxu1 %v2549_v12 }
 0x1cd   :  { %2552 = vmatpush3.bf16.msra.mxu1 %v2549_v12 }
 0x1ce   :  { %2554 = vmatprep.subr.bf16.mxu1 %v2553_v16 }
 0x1d1   :  { %2556 = vmatpush3.bf16.msra.mxu1 %v2553_v16 }
 0x1d2   :  { %2558 = vmatprep.subr.bf16.mxu1 %v2557_v18 }
 0x1d5   :  { %2560 = vmatpush3.bf16.msra.mxu1 %v2557_v18 }
 0x287   :  { %v2326_v44 = vpop.f32.mrb[2].mxu1 }
 0x288   :  { %v407_v45 = vmul.f32 %v2326_v44, %v2866_v39  ;;  %v397_v46 = vpop.f32.mrb[3].mxu1 }
 0x289   :  { %v406_v47 = vmul.f32 %v397_v46, %v2871_v40 }
 0x28b   :  { %v2521_v48 = vpack.c.bf16 %v407_v45, %v406_v47  ;;  %v2345_v49 = vpop.f32.mrb[4].mxu1 }
 0x28c   :  { %v645_v50 = vpop.f32.mrb[5].mxu1  ;;  %vm655_vm4 = vcmp.gt.f32.partialorder %v2345_v49, 0.5 }
 0x28d   :  { %2522 = vmatprep.subr.bf16.mxu0 %v2521_v48  ;;  %vm654_vm6 = vcmp.gt.f32.partialorder %v645_v50, 0.5 }
 0x28e   :  { %2524 = vmatpush3.bf16.msra.mxu0 %v2521_v48 }
 0x28f   :  { %2334 = vmatprep.subr.mxu0 %v46_v33 }
 0x291   :  { %2332 = vmatmul.mubr.msk.f32.vlgmr.msra.gmra.mrb[4].mxu0 %vm69_vm0, %v2697_v38 }
 0x292   :  { %2335 = vmatpush3.msra.mxu0 %v46_v33  ;;  %2336 = vmatprep.mubr.msk.f32.mxu0 %vm324_vm2, %v315_v37 }
 0x293   :  { %2381 = vmatprep.subr.mxu0 %v46_v33 }
 0x299   :  { %2337 = vmatmul.mubr.msk.f32.vlgmr.msra.gmra.mrb[4].mxu0 %vm324_vm2, %v2321_v35 }
 0x29a   :  { %2382 = vmatpush3.msra.mxu0 %v46_v33  ;;  %v2638_v33 = vpop.permute.xlu1 %2637 }
 0x29b   :  { %2562 = vmatprep.subr.bf16.mxu0 %v2848_v32  ;;  %v2640_v34 = vunpack.i.h.bf16 %v2638_v33  ;;  %v2639_v35 = vunpack.i.l.bf16 %v2638_v33 }
 0x29d   :  { %v2565_v41 = vpack.c.bf16 %v2640_v34, %v2639_v35  ;;  %v1632_v34 = vld [vmem:[%s3068_s5] sm:$0xff]  ;;  %v1633_v35 = vld [vmem:[%s3068_s5 + $0x8] sm:$0xff] }
 0x29e   :  { %v2643_v44 = vpop.permute.xlu1 %2642 }
 0x29f   :  { %v2645_v46 = vunpack.i.h.bf16 %v2643_v44  ;;  %v2644_v47 = vunpack.i.l.bf16 %v2643_v44  ;;  %v1635_v44 = vld [vmem:[%s3068_s5 + $0x18] sm:$0xff] }
 0x2a1   :  { %v2569_v51 = vpack.c.bf16 %v2645_v46, %v2644_v47 }
 0x36c   :  { %v2338_v63 = vpop.f32.mrb[4].mxu0 }
 0x36d   :  { %vm568_vm3 = vcmp.gt.f32.partialorder %v2338_v63, 0.0  ;;  %v570_v0 = vmul.f32 0.2, %v2338_v63  ;;  %v558_v1 = vpop.f32.mrb[5].mxu0 }
 0x36e   :  { %vm567_vm5 = vcmp.gt.f32.partialorder %v558_v1, 0.0  ;;  %v569_v2 = vmul.f32 0.2, %v558_v1 }
 0x36f   :  { %v572_v3 = vsel %vm568_vm3, %v2338_v63, %v570_v0 }
 0x370   :  { %v571_v4 = vsel %vm567_vm5, %v558_v1, %v569_v2  ;;  %v657_v5 = vsel %vm655_vm4, %v572_v3, -1e+30  ;;  %vm1992_vm4 = vcmp.gt.f32.partialorder %v2878_v42, 0.5 }
 0x371   :  { %v656_v6 = vsel %vm654_vm6, %v571_v4, -1e+30 }
 0x372   :  { %658 = vmax.xlane.f32.xlu0 %v656_v6 }
 0x376   :  { %660 = vmax.xlane.f32.xlu0 %v657_v5 }
 0x3ff   :  { %v659_v19 = vpop.xlane.xlu0 %658 }
 0x400   :  { %v662_v20 = vsub.f32 %v656_v6, %v659_v19 }
 0x402   :  { %v664_v21 = vmul.f32 1.442695, %v662_v20 }
 0x403   :  { %v661_v22 = vpop.xlane.xlu0 %660 }
 0x404   :  { %2673 = vpow2.f32 %v664_v21  ;;  %v663_v23 = vsub.f32 %v657_v5, %v661_v22 }
 0x406   :  { %v666_v24 = vmul.f32 1.442695, %v663_v23 }
 0x408   :  { %2675 = vpow2.f32 %v666_v24 }
 0x40e   :  { %v2674_v25 = vpop.eup %2673 }
 0x40f   :  { %2378 = vmatprep.mubr.f32.mxu1 %v2674_v25 }
 0x412   :  { %v2676_v26 = vpop.eup %2675 }
 0x413   :  { %2379 = vmatmul.mubr.f32.vlgmr.msra.gmra.mrb[6].mxu1 %v2676_v26 }
 0x4e6   :  { %v2380_v27 = vpop.f32.mrb[6].mxu1 }
 0x4e7   :  { %v744_v28 = vmax.f32 %v2380_v27, 1e-20  ;;  %v734_v29 = vpop.f32.mrb[7].mxu1 }
 0x4e8   :  { %v743_v30 = vmax.f32 %v734_v29, 1e-20 }
 0x4ea   :  { %2677 = vrcp.f32 %v743_v30 }
 0x4eb   :  { %2679 = vrcp.f32 %v744_v28 }
 0x4f4   :  { %v2678_v36 = vpop.eup %2677 }
 0x4f5   :  { %v2680_v37 = vpop.eup %2679  ;;  %2383 = vmatprep.mubr.msk.f32.mxu0 %vm324_vm2, %v2678_v36  ;;  %v2593_v36 = vpack.c.bf16 %v1633_v35, %v1632_v34  ;;  %v2709_v34 = vmov 0  }
 0x4f6   :  { %2384 = vmatmul.mubr.msk.f32.vlgmr.msra.gmra.mrb[6].mxu0 %vm324_vm2, %v2680_v37  ;;  %2672 = vset.pattern.permute.xlu1 %v2709_v34 }
 0x4f7   :  { %2564 = vmatpush3.bf16.msra.mxu0 %v2848_v32  ;;  %v2648_v32 = vpop.permute.xlu1 %2647  ;;  %2671 = vset.pattern.permute.xlu0 %v2709_v34 }
 0x4f8   :  { %2566 = vmatprep.subr.bf16.mxu0 %v2565_v41  ;;  %v2650_v53 = vunpack.i.h.bf16 %v2648_v32 }
 0x4fb   :  { %v2653_v52 = vpop.permute.xlu1 %2652 }
 0x4fc   :  { %v2655_v62 = vunpack.i.h.bf16 %v2653_v52  ;;  %v2654_v63 = vunpack.i.l.bf16 %v2653_v52  ;;  %v1639_v52 = vld [vmem:[%s3068_s5 + $0x38] sm:$0xff] }
 0x4fe   :  { %v2577_v2 = vpack.c.bf16 %v2655_v62, %v2654_v63 }
 0x5c9   :  { %v2385_v45 = vpop.f32.mrb[6].mxu0 }
 0x5ca   :  { %v831_v48 = vmul.f32 %v2676_v26, %v2385_v45  ;;  %v821_v49 = vpop.f32.mrb[7].mxu0  ;;  %v1636_v45 = vld [vmem:[%s3068_s5 + $0x20] sm:$0xff] }
 0x5cb   :  { %v830_v50 = vmul.f32 %v2674_v25, %v821_v49 }
 0x5cc   :  { %915 = vrot.lane.b32.xlu1 %v831_v48, %s2694_s29 }
 0x5cd   :  { %913 = vrot.lane.b32.xlu0 %v830_v50, %s2694_s29  ;;  %2390 = vmatprep.mubr.msk.f32.mxu0 %vm69_vm0, %v830_v50  ;;  %s2701_s29 = smov 72  }
 0x5ce   :  { %2391 = vmatmul.mubr.msk.f32.vlgmr.msra.gmra.mrb[8].mxu0 %vm69_vm0, %v831_v48 }
 0x5cf   :  { %2568 = vmatpush3.bf16.msra.mxu0 %v2565_v41  ;;  %v1634_v41 = vld [vmem:[%s3068_s5 + $0x10] sm:$0xff] }
 0x5d0   :  { %2570 = vmatprep.subr.bf16.mxu0 %v2569_v51  ;;  %1004 = vrot.lane.b32.xlu1 %v831_v48, %s2696_s14  ;;  %v2597_v47 = vpack.c.bf16 %v1635_v44, %v1634_v41 }
 0x5d1   :  { %1093 = vrot.lane.b32.xlu0 %v831_v48, %s2698_s12 }
 0x5d4   :  { %2657 = vrot.lane.b32.xlu1 %v2844_v31, %s2699_s2  ;;  %s2708_s2 = smov 56  }
 0x5d5   :  { %2662 = vrot.lane.b32.xlu0 %v2844_v31, %s2698_s12 }
 0x5d8   :  { %1182 = vrot.lane.b32.xlu1 %v831_v48, %s2700_s3 }
 0x5d9   :  { %1180 = vrot.lane.b32.xlu0 %v830_v50, %s2700_s3 }
 0x5dc   :  { %1002 = vrot.lane.b32.xlu1 %v830_v50, %s2696_s14  ;;  %s2705_s14 = smov 8  }
 0x5dd   :  { %2667 = vrot.lane.b32.xlu0 %v2844_v31, %s2701_s29  ;;  %v2649_v31 = vunpack.i.l.bf16 %v2648_v32  ;;  %v1638_v32 = vld [vmem:[%s3068_s5 + $0x30] sm:$0xff] }
 0x5df   :  { %v2573_v56 = vpack.c.bf16 %v2650_v53, %v2649_v31  ;;  %v2605_v53 = vpack.c.bf16 %v1639_v52, %v1638_v32  ;;  %v1721_v31 = vld [vmem:[%s3069_s6] sm:$0xf] }
 0x5e0   :  { %1091 = vrot.lane.b32.xlu1 %v830_v50, %s2698_s12 }
 0x5e1   :  { %1358 = vrot.lane.b32.xlu0 %v830_v50, %s2702_s28 }
 0x5e4   :  { %1271 = vrot.lane.b32.xlu1 %v831_v48, %s2703_s30 }
 0x5e5   :  { %1447 = vrot.lane.b32.xlu0 %v830_v50, %s2704_s10 }
 0x5e8   :  { %1269 = vrot.lane.b32.xlu1 %v830_v50, %s2703_s30 }
 0x5ec   :  { %1360 = vrot.lane.b32.xlu1 %v831_v48, %s2702_s28 }
 0x5f0   :  { %1449 = vrot.lane.b32.xlu1 %v831_v48, %s2704_s10  ;;  %v1637_v48 = vld [vmem:[%s3068_s5 + $0x28] sm:$0xff] }
 0x5f1   :  { %v2601_v50 = vpack.c.bf16 %v1637_v48, %v1636_v45 }
 0x63e   :  { %v916_v54 = vpop.permute.xlu1 %915 }
 0x63f   :  { %v914_v55 = vpop.permute.xlu0 %913 }
 0x640   :  { %2397 = vmatprep.mubr.msk.f32.mxu0 %vm69_vm0, %v914_v55 }
 0x641   :  { %2398 = vmatmul.mubr.msk.f32.vlgmr.msra.gmra.mrb[10].mxu0 %vm69_vm0, %v916_v54 }
 0x642   :  { %2572 = vmatpush3.bf16.msra.mxu0 %v2569_v51  ;;  %v1005_v57 = vpop.permute.xlu1 %1004 }
 0x643   :  { %2574 = vmatprep.subr.bf16.mxu0 %v2573_v56  ;;  %v1094_v58 = vpop.permute.xlu0 %1093 }
 0x646   :  { %v2658_v59 = vpop.permute.xlu1 %2657 }
 0x647   :  { %v2663_v60 = vpop.permute.xlu0 %2662  ;;  %v2660_v4 = vunpack.i.h.bf16 %v2658_v59  ;;  %v2659_v5 = vunpack.i.l.bf16 %v2658_v59 }
 0x648   :  { %v2665_v12 = vunpack.i.h.bf16 %v2663_v60  ;;  %v2664_v13 = vunpack.i.l.bf16 %v2663_v60 }
 0x649   :  { %v2581_v11 = vpack.c.bf16 %v2660_v4, %v2659_v5 }
 0x64a   :  { %v1183_v61 = vpop.permute.xlu1 %1182  ;;  %v2585_v16 = vpack.c.bf16 %v2665_v12, %v2664_v13 }
 0x64b   :  { %v1181_v0 = vpop.permute.xlu0 %1180 }
 0x64e   :  { %v1003_v1 = vpop.permute.xlu1 %1002 }
 0x64f   :  { %v2668_v3 = vpop.permute.xlu0 %2667  ;;  %2404 = vmatprep.mubr.msk.f32.mxu0 %vm69_vm0, %v1003_v1 }
 0x650   :  { %v2670_v6 = vunpack.i.h.bf16 %v2668_v3  ;;  %v2669_v7 = vunpack.i.l.bf16 %v2668_v3  ;;  %2405 = vmatmul.mubr.msk.f32.vlgmr.msra.gmra.mrb[12].mxu0 %vm69_vm0, %v1005_v57 }
 0x651   :  { %2576 = vmatpush3.bf16.msra.mxu0 %v2573_v56 }
 0x652   :  { %v2589_v8 = vpack.c.bf16 %v2670_v6, %v2669_v7  ;;  %2578 = vmatprep.subr.bf16.mxu0 %v2577_v2  ;;  %v1092_v9 = vpop.permute.xlu1 %1091 }
 0x653   :  { %v1359_v10 = vpop.permute.xlu0 %1358  ;;  %2411 = vmatprep.mubr.msk.f32.mxu0 %vm69_vm0, %v1092_v9 }
 0x654   :  { %2412 = vmatmul.mubr.msk.f32.vlgmr.msra.gmra.mrb[14].mxu0 %vm69_vm0, %v1094_v58  ;;  %2590 = vmatprep.subr.bf16.mxu1 %v2589_v8 }
 0x655   :  { %2580 = vmatpush3.bf16.msra.mxu0 %v2577_v2  ;;  %2418 = vmatprep.mubr.msk.f32.mxu0 %vm69_vm0, %v1181_v0 }
 0x656   :  { %2582 = vmatprep.subr.bf16.mxu0 %v2581_v11  ;;  %2592 = vmatpush3.bf16.msra.mxu1 %v2589_v8  ;;  %v1272_v14 = vpop.permute.xlu1 %1271 }
 0x657   :  { %v1448_v15 = vpop.permute.xlu0 %1447  ;;  %2461 = vmatprep.subr.msk.mxu1 %vm1729_vm7, %v1721_v31 }
 0x658   :  { %2419 = vmatmul.mubr.msk.f32.vlgmr.msra.gmra.mrb[16].mxu0 %vm69_vm0, %v1183_v61  ;;  %2439 = vmatprep.mubr.msk.f32.mxu1 %vm69_vm0, %v1448_v15 }
 0x659   :  { %2584 = vmatpush3.bf16.msra.mxu0 %v2581_v11  ;;  %v2146_v11 = vld [vmem:[%s3070_s4] ss:$0 sm:$0xff] }
 0x65a   :  { %2586 = vmatprep.subr.bf16.mxu0 %v2585_v16  ;;  %v1270_v17 = vpop.permute.xlu1 %1269 }
 0x65b   :  { %2425 = vmatprep.mubr.msk.f32.mxu0 %vm69_vm0, %v1270_v17 }
 0x65c   :  { %2426 = vmatmul.mubr.msk.f32.vlgmr.msra.gmra.mrb[18].mxu0 %vm69_vm0, %v1272_v14 }
 0x65d   :  { %2588 = vmatpush3.bf16.msra.mxu0 %v2585_v16  ;;  %2432 = vmatprep.mubr.msk.f32.mxu0 %vm69_vm0, %v1359_v10 }
 0x65e   :  { %v1361_v18 = vpop.permute.xlu1 %1360  ;;  %2594 = vmatprep.subr.bf16.mxu0 %v2593_v36 }
 0x660   :  { %2433 = vmatmul.mubr.msk.f32.vlgmr.msra.gmra.mrb[20].mxu0 %vm69_vm0, %v1361_v18 }
 0x661   :  { %2596 = vmatpush3.bf16.msra.mxu0 %v2593_v36 }
 0x662   :  { %v1450_v19 = vpop.permute.xlu1 %1449  ;;  %2598 = vmatprep.subr.bf16.mxu0 %v2597_v47 }
 0x663   :  { %2440 = vmatmul.mubr.msk.f32.vlgmr.msra.gmra.mrb[8].mxu1 %vm69_vm0, %v1450_v19 }
 0x664   :  { %2462 = vmatpush3.msk.msra.mxu1 %vm1729_vm7, %v1721_v31 }
 0x665   :  { %2600 = vmatpush3.bf16.msra.mxu0 %v2597_v47 }
 0x666   :  { %2602 = vmatprep.subr.bf16.mxu0 %v2601_v50 }
 0x669   :  { %2604 = vmatpush3.bf16.msra.mxu0 %v2601_v50 }
 0x66a   :  { %2606 = vmatprep.subr.bf16.mxu0 %v2605_v53 }
 0x66d   :  { %2608 = vmatpush3.bf16.msra.mxu0 %v2605_v53 }
 0x6a1   :  { %v2976_v20 = vpop.f32.mrb[8].mxu0 }
 0x6a2   :  { %v2978_v21 = vpop.f32.mrb[9].mxu0 }
 0x714   :  { %v2399_v22 = vpop.f32.mrb[10].mxu0 }
 0x715   :  { %1540 = vrot.lane.b32.xlu1 %v2399_v22, %s2705_s14  ;;  %v993_v23 = vpop.f32.mrb[11].mxu0 }
 0x716   :  { %1538 = vrot.lane.b32.xlu0 %v993_v23, %s2705_s14 }
 0x723   :  { %v2406_v24 = vpop.f32.mrb[12].mxu0 }
 0x724   :  { %1548 = vrot.lane.b32.xlu1 %v2406_v24, %s2704_s10  ;;  %v1082_v25 = vpop.f32.mrb[13].mxu0 }
 0x725   :  { %1546 = vrot.lane.b32.xlu0 %v1082_v25, %s2704_s10 }
 0x727   :  { %v2413_v26 = vpop.f32.mrb[14].mxu0 }
 0x728   :  { %1556 = vrot.lane.b32.xlu1 %v2413_v26, %s2706_s15  ;;  %v1171_v27 = vpop.f32.mrb[15].mxu0 }
 0x729   :  { %1554 = vrot.lane.b32.xlu0 %v1171_v27, %s2706_s15 }
 0x72b   :  { %v2420_v28 = vpop.f32.mrb[16].mxu0 }
 0x72c   :  { %1564 = vrot.lane.b32.xlu1 %v2420_v28, %s2702_s28  ;;  %v1260_v29 = vpop.f32.mrb[17].mxu0 }
 0x72d   :  { %1562 = vrot.lane.b32.xlu0 %v1260_v29, %s2702_s28 }
 0x72f   :  { %v2427_v30 = vpop.f32.mrb[18].mxu0 }
 0x730   :  { %1572 = vrot.lane.b32.xlu1 %v2427_v30, %s2707_s16  ;;  %v1349_v33 = vpop.f32.mrb[19].mxu0 }
 0x731   :  { %1570 = vrot.lane.b32.xlu0 %v1349_v33, %s2707_s16  ;;  %v1808_v33 = vld [vmem:[%s3071_s7] sm:$0xf] }
 0x732   :  { %2466 = vmatprep.subr.msk.mxu1 %vm1729_vm7, %v1808_v33 }
 0x733   :  { %v2434_v37 = vpop.f32.mrb[20].mxu0 }
 0x734   :  { %1580 = vrot.lane.b32.xlu1 %v2434_v37, %s2703_s30  ;;  %v1438_v46 = vpop.f32.mrb[21].mxu0 }
 0x735   :  { %1578 = vrot.lane.b32.xlu0 %v1438_v46, %s2703_s30 }
 0x736   :  { %v2441_v49 = vpop.f32.mrb[8].mxu1 }
 0x737   :  { %v1527_v51 = vpop.f32.mrb[9].mxu1 }
 0x738   :  { %1588 = vrot.lane.b32.xlu1 %v2441_v49, %s2708_s2 }
 0x739   :  { %1586 = vrot.lane.b32.xlu0 %v1527_v51, %s2708_s2 }
 0x787   :  { %v1541_v54 = vpop.permute.xlu1 %1540 }
 0x788   :  { %v1539_v55 = vpop.permute.xlu0 %1538  ;;  %v1593_v0 = vsel %vm324_vm2, %v2976_v20, %v1541_v54 }
 0x789   :  { %v1592_v1 = vsel %vm324_vm2, %v2978_v21, %v1539_v55  ;;  %vm1993_vm2 = vcmp.gt.f32.partialorder %v2883_v43, 0.5 }
 0x796   :  { %v1549_v56 = vpop.permute.xlu1 %1548 }
 0x797   :  { %v1547_v57 = vpop.permute.xlu0 %1546  ;;  %v1595_v2 = vsel %vm69_vm0, %v1593_v0, %v1549_v56 }
 0x798   :  { %v1594_v4 = vsel %vm69_vm0, %v1592_v1, %v1547_v57 }
 0x79a   :  { %v1557_v58 = vpop.permute.xlu1 %1556 }
 0x79b   :  { %v1555_v59 = vpop.permute.xlu0 %1554  ;;  %v1598_v5 = vsel %vm1596_vm8, %v1595_v2, %v1557_v58 }
 0x79c   :  { %v1597_v7 = vsel %vm1596_vm8, %v1594_v4, %v1555_v59 }
 0x79e   :  { %v1565_v60 = vpop.permute.xlu1 %1564 }
 0x79f   :  { %v1563_v61 = vpop.permute.xlu0 %1562  ;;  %v1601_v8 = vsel %vm1599_vm9, %v1598_v5, %v1565_v60 }
 0x7a0   :  { %v1600_v9 = vsel %vm1599_vm9, %v1597_v7, %v1563_v61 }
 0x7a2   :  { %v1573_v62 = vpop.permute.xlu1 %1572 }
 0x7a3   :  { %v1571_v63 = vpop.permute.xlu0 %1570  ;;  %v1604_v10 = vsel %vm1602_vm10, %v1601_v8, %v1573_v62 }
 0x7a4   :  { %v1603_v12 = vsel %vm1602_vm10, %v1600_v9, %v1571_v63 }
 0x7a6   :  { %v1581_v3 = vpop.permute.xlu1 %1580 }
 0x7a7   :  { %v1579_v6 = vpop.permute.xlu0 %1578  ;;  %v1607_v13 = vsel %vm1605_vm11, %v1604_v10, %v1581_v3 }
 0x7a8   :  { %v1606_v15 = vsel %vm1605_vm11, %v1603_v12, %v1579_v6 }
 0x7aa   :  { %v1589_v14 = vpop.permute.xlu1 %1588 }
 0x7ab   :  { %v1610_v16 = vsel %vm1608_vm12, %v1607_v13, %v1589_v14  ;;  %v1587_v17 = vpop.permute.xlu0 %1586  ;;  %v2159_v13 = vld [vmem:[%s3072_s8] ss:$0 sm:$0xff] }
 0x7ac   :  { %v1619_v18 = vadd.f32 %v2146_v11, %v1610_v16  ;;  %v1609_v19 = vsel %vm1608_vm12, %v1606_v15, %v1587_v17 }
 0x7ad   :  { %v1618_v20 = vadd.f32 %v2146_v11, %v1609_v19 }
 0x7ae   :  { %v1623_v21 = vmin.f32 %v1619_v18, 0.0  ;;  %vm1621_vm14 = vcmp.gt.f32.partialorder %v1619_v18, 0.0 }
 0x7af   :  { %v1622_v22 = vmin.f32 %v1618_v20, 0.0  ;;  %vm1620_vm13 = vcmp.gt.f32.partialorder %v1618_v20, 0.0 }
 0x7b0   :  { %v1626_v23 = vmul.f32 1.442695, %v1623_v21 }
 0x7b1   :  { %v1624_v24 = vmul.f32 1.442695, %v1622_v22 }
 0x7b2   :  { %2681 = vpow2.f32 %v1626_v23 }
 0x7b3   :  { %2683 = vpow2.f32 %v1624_v24 }
 0x7bc   :  { %v2682_v25 = vpop.eup %2681 }
 0x7bd   :  { %v2684_v26 = vpop.eup %2683  ;;  %v2148_v27 = vadd.f32 -1.0, %v2682_v25 }
 0x7be   :  { %v2147_v28 = vadd.f32 -1.0, %v2684_v26 }
 0x7bf   :  { %v1631_v30 = vsel %vm1621_vm14, %v1619_v18, %v2148_v27 }
 0x7c0   :  { %v1630_v29 = vsel %vm1620_vm13, %v1618_v20, %v2147_v28 }
 0x7c1   :  { %2458 = vmatprep.mubr.msk.f32.mxu0 %vm159_vm1, %v1630_v29 }
 0x7c2   :  { %2459 = vmatmul.mubr.msk.f32.vlgmr.msra.gmra.mrb[22].mxu0 %vm159_vm1, %v1631_v30 }
 0x895   :  { %v2460_v35 = vpop.f32.mrb[22].mxu0 }
 0x896   :  { %v1712_v36 = vpop.f32.mrb[23].mxu0 }
 0x897   :  { %v2613_v37 = vpack.c.bf16 %v2460_v35, %v1712_v36  ;;  %2463 = vmatprep.mubr.msk.f32.mxu1 %vm1722_vm15, %v1712_v36 }
 0x898   :  { %2464 = vmatmul.mubr.msk.f32.vlgmr.msra.gmra.mrb[10].mxu1 %vm1722_vm15, %v2460_v35 }
 0x899   :  { %2468 = vmatprep.mubr.msk.f32.mxu1 %vm1722_vm15, %v1712_v36  ;;  %2467 = vmatpush3.msk.msra.mxu1 %vm1729_vm7, %v1808_v33 }
 0x89c   :  { %2469 = vmatmul.mubr.msk.f32.vlgmr.msra.gmra.mrb[12].mxu1 %vm1722_vm15, %v2460_v35 }
 0x89d   :  { %2475 = vmatprep.mubr.msk.f32.mxu1 %vm69_vm0, %v2697_v38 }
 0x96b   :  { %v2465_v41 = vpop.f32.mrb[10].mxu1 }
 0x96c   :  { %1894 = vperm.xlu1 %2672, %v2465_v41   ;;  %v1799_v44 = vpop.f32.mrb[11].mxu1 }
 0x96d   :  { %1889 = vperm.xlu0 %2671, %v1799_v44  }
 0x96f   :  { %v2470_v45 = vpop.f32.mrb[12].mxu1 }
 0x970   :  { %v1878_v46 = vpop.f32.mrb[13].mxu1 }
 0x971   :  { %1981 = vperm.xlu0 %2671, %v2470_v45   ;;  %1976 = vperm.xlu1 %2672, %v1878_v46  }
 0x9eb   :  { %v1895_v47 = vpop.permute.xlu1 %1894 }
 0x9ec   :  { %v1898_v48 = vmul.f32 %v1895_v47, %v2866_v39  ;;  %v1890_v49 = vpop.permute.xlu0 %1889 }
 0x9ed   :  { %v1897_v50 = vmul.f32 %v1890_v49, %v2871_v40 }
 0x9ef   :  { %v2609_v51 = vpack.c.bf16 %v1898_v48, %v1897_v50 }
 0x9f0   :  { %v1982_v32 = vpop.permute.xlu0 %1981  ;;  %v1977_v53 = vpop.permute.xlu1 %1976 }
 0x9f1   :  { %2610 = vmatprep.subr.bf16.mxu1 %v2609_v51 }
 0x9f2   :  { %2612 = vmatpush3.bf16.msra.mxu1 %v2609_v51 }
 0x9f3   :  { %2614 = vmatprep.subr.bf16.mxu1 %v2613_v37 }
 0x9f5   :  { %2476 = vmatmul.mubr.msk.f32.vlgmr.msra.gmra.mrb[14].mxu1 %vm69_vm0, %v2697_v38 }
 0x9f6   :  { %2616 = vmatpush3.bf16.msra.mxu1 %v2613_v37 }
 0xac8   :  { %v2477_v52 = vpop.f32.mrb[14].mxu1 }
 0xac9   :  { %v1985_v31 = vadd.f32 %v2477_v52, %v1982_v32  ;;  %v1965_v54 = vpop.f32.mrb[15].mxu1 }
 0xaca   :  { %v1984_v55 = vadd.f32 %v1977_v53, %v1965_v54 }
 0xacb   :  { %v1989_v56 = vmul.f32 0.2, %v1985_v31  ;;  %vm1987_vm1 = vcmp.gt.f32.partialorder %v1985_v31, 0.0 }
 0xacc   :  { %v1988_v39 = vmul.f32 0.2, %v1984_v55  ;;  %vm1986_vm3 = vcmp.gt.f32.partialorder %v1984_v55, 0.0 }
 0xacd   :  { %v1991_v40 = vsel %vm1987_vm1, %v1985_v31, %v1989_v56 }
 0xace   :  { %v1995_v57 = vsel %vm1993_vm2, %v1991_v40, -1e+30  ;;  %v1990_v58 = vsel %vm1986_vm3, %v1984_v55, %v1988_v39 }
 0xacf   :  { %v1999_v38 = vsel %vm69_vm0, %v1995_v57, -inf  ;;  %v1994_v59 = vsel %vm1992_vm4, %v1990_v58, -1e+30 }
 0xad0   :  { %2000 = vmax.xlane.f32.xlu0 %v1999_v38  ;;  %v1996_v60 = vsel %vm69_vm0, %v1994_v59, -inf }
 0xad1   :  { %1997 = vmax.xlane.f32.xlu1 %v1996_v60 }
 0xb5d   :  { %v2001_v61 = vpop.xlane.xlu0 %2000 }
 0xb5e   :  { %v2003_v62 = vsub.f32 %v1995_v57, %v2001_v61  ;;  %v1998_v63 = vpop.xlane.xlu1 %1997 }
 0xb5f   :  { %v2002_v0 = vsub.f32 %v1994_v59, %v1998_v63 }
 0xb60   :  { %v2006_v1 = vmul.f32 1.442695, %v2003_v62 }
 0xb61   :  { %v2004_v43 = vmul.f32 1.442695, %v2002_v0 }
 0xb62   :  { %2685 = vpow2.f32 %v2006_v1 }
 0xb63   :  { %2687 = vpow2.f32 %v2004_v43 }
 0xb6c   :  { %v2686_v2 = vpop.eup %2685 }
 0xb6d   :  { %v2688_v42 = vpop.eup %2687  ;;  %v2011_v3 = vsel %vm69_vm0, %v2686_v2, 0.0 }
 0xb6e   :  { %2012 = vadd.xlane.f32.xlu1 %v2011_v3  ;;  %v2008_v4 = vsel %vm69_vm0, %v2688_v42, 0.0 }
 0xb6f   :  { %2009 = vadd.xlane.f32.xlu0 %v2008_v4 }
 0xbfb   :  { %v2013_v5 = vpop.xlane.xlu1 %2012 }
 0xbfc   :  { %v2015_v6 = vmax.f32 %v2013_v5, 1e-20  ;;  %v2010_v7 = vpop.xlane.xlu0 %2009 }
 0xbfd   :  { %v2014_v8 = vmax.f32 %v2010_v7, 1e-20 }
 0xbfe   :  { %2689 = vrcp.f32 %v2015_v6 }
 0xbff   :  { %2691 = vrcp.f32 %v2014_v8 }
 0xc08   :  { %v2690_v9 = vpop.eup %2689 }
 0xc09   :  { %v2692_v10 = vpop.eup %2691  ;;  %v2019_v12 = vmul.f32 %v2690_v9, %v2686_v2 }
 0xc0a   :  { %v2017_v11 = vmul.f32 %v2692_v10, %v2688_v42 }
 0xc0c   :  { %2482 = vmatprep.mubr.msk.f32.mxu1 %vm69_vm0, %v2017_v11 }
 0xc0d   :  { %2483 = vmatmul.mubr.msk.f32.vlgmr.msra.gmra.mrb[16].mxu1 %vm69_vm0, %v2019_v12 }
 0xce0   :  { %v2484_v14 = vpop.f32.mrb[16].mxu1 }
 0xce1   :  { %v2105_v15 = vadd.f32 %v2484_v14, %v2159_v13  ;;  %v2099_v16 = vpop.f32.mrb[17].mxu1 }
 0xce2   :  { %v2100_v17 = vadd.f32 %v2159_v13, %v2099_v16 }
 0xce3   :  { %2109 = vst.msk [vmem:[%s3073_s13 + $0x8] sm:$0xff] %vm1722_vm15, %v2105_v15 }
 0xce4   :  { %2108 = vst.msk [vmem:[%s3073_s13] sm:$0xff] %vm1722_vm15, %v2100_v17 }

</bundles_post_ra>
